<compile_context>
chip_gen: v6e
topology: v6e:2x2x1
jax: 0.10.0
libtpu: 0.0.40
codegen_flags: <defaults>
</compile_context>

<pallas_src>
import functools

import jax
import jax.numpy as jnp
from jax.experimental import pallas as pl
from jax.experimental.pallas import tpu as pltpu

_LANES = 128
_SUBLANES = 8
_MAX_TILE_ROWS = 4096   # 4096x128 f32 = 2 MiB/block; 2 inputs x 2 buffers = 8 MiB VMEM


def _round_up(x, m):
    return ((x + m - 1) // m) * m


def _tc_split_config():
    """(nsplit, split_axis_semantics) chosen from the local chip generation.

    v5e/v6e (and v2/v3) expose one TensorCore per jax device -> no split.
    v4/v5p megacore shards a "parallel" leading grid axis across its two cores.
    v7x needs CORE_PARALLEL on the leading axis to actually engage both TCs.
    """
    try:
        kind = jax.devices()[0].device_kind.lower()
    except Exception:  # pragma: no cover - defensive
        return 1, pltpu.ARBITRARY
    if "7" in kind:
        return 2, pltpu.CORE_PARALLEL
    if "v4" in kind or "v5p" in kind:
        return 2, pltpu.PARALLEL
    return 1, pltpu.ARBITRARY


def _error_kernel(pred_ref, target_ref, acc_ref, *, metric, tiles_per_split,
                  num_full_blocks, partial_valid_rows, guard_full_blocks):
    s = pl.program_id(0)            # TensorCore split (leading axis)
    i = pl.program_id(1)            # row-tile index within the split (reduction axis)
    block_id = s * tiles_per_split + i

    @pl.when(i == 0)
    def _init():
        acc_ref[...] = jnp.zeros_like(acc_ref)

    def _accumulate(valid_rows_in_block):
        d = pred_ref[...].astype(jnp.float32) - target_ref[...].astype(jnp.float32)
        v = jnp.abs(d) if metric == "mae" else d * d
        if valid_rows_in_block is not None:
            # Only emitted (and only executed) for the single partial edge block.
            ridx = jax.lax.broadcasted_iota(jnp.int32, v.shape, 0)
            v = jnp.where(ridx < valid_rows_in_block, v, 0.0)
        # Pure-VPU accumulation into the resident lane-dense (8,128) output block;
        # the single cross-lane/sublane reduce happens afterwards in JAX.
        acc_ref[...] += v.reshape(-1, _SUBLANES, _LANES).sum(axis=0)

    if num_full_blocks > 0:
        if guard_full_blocks:
            @pl.when(block_id < num_full_blocks)
            def _full():
                _accumulate(None)
        else:
            # Hot path: every grid step is a full interior block -> no mask,
            # no conditionals, just stream + accumulate.
            _accumulate(None)

    if partial_valid_rows is not None:
        @pl.when(block_id == num_full_blocks)
        def _partial():
            _accumulate(partial_valid_rows)
    # block_id > last real block (clamped duplicate on an over-provisioned split)
    # falls through both guards and contributes nothing.


def _error_sum_2d(p2, t2, metric, rows):
    """Sum of |p-t| (mae) or (p-t)^2 (mse) over a lane-dense [rows,128] slab."""
    row_mult = 16 if p2.dtype.itemsize == 2 else _SUBLANES   # bf16/f16 pack 16 rows
    tile_rows = min(_MAX_TILE_ROWS, _round_up(rows, row_mult))

    total_blocks = -(-rows // tile_rows)
    num_full_blocks = rows // tile_rows
    has_partial = (rows % tile_rows) != 0
    partial_valid_rows = (rows - num_full_blocks * tile_rows) if has_partial else None

    nsplit, split_sem = _tc_split_config()
    if total_blocks < 2:
        nsplit, split_sem = 1, pltpu.ARBITRARY
    tiles_per_split = -(-total_blocks // nsplit)
    has_dup = nsplit * tiles_per_split > total_blocks
    guard_full_blocks = has_partial or has_dup

    if has_dup:
        max_block = total_blocks - 1

        def in_map(s, i):
            # Never DMA past the array; the duplicated block's compute is skipped.
            return (jnp.minimum(s * tiles_per_split + i, max_block), 0)
    else:
        def in_map(s, i):
            return (s * tiles_per_split + i, 0)

    kernel = functools.partial(
        _error_kernel, metric=metric, tiles_per_split=tiles_per_split,
        num_full_blocks=num_full_blocks, partial_valid_rows=partial_valid_rows,
        guard_full_blocks=guard_full_blocks)

    acc = pl.pallas_call(
        kernel,
        out_shape=jax.ShapeDtypeStruct((nsplit * _SUBLANES, _LANES), jnp.float32),
        grid_spec=pltpu.PrefetchScalarGridSpec(
            num_scalar_prefetch=0,
            grid=(nsplit, tiles_per_split),
            in_specs=[
                pl.BlockSpec((tile_rows, _LANES), in_map),
                pl.BlockSpec((tile_rows, _LANES), in_map),
            ],
            # Lane-dense per-split accumulator block, revisited across the
            # reduction axis (same block index for all i).
            out_specs=pl.BlockSpec((_SUBLANES, _LANES), lambda s, i: (s, 0)),
        ),
        compiler_params=pltpu.CompilerParams(
            dimension_semantics=(split_sem, pltpu.ARBITRARY),
            vmem_limit_bytes=32 * 1024 * 1024,
        ),
    )(p2, t2)
    return jnp.sum(acc)


def error_pallas(pred, target, metric="mae"):
    """Pallas TPU equivalent of Error.forward (mean abs / squared error)."""
    if metric not in ("mae", "mse"):
        raise TypeError(f"type should be mse or mae but got {metric}")
    pred = jnp.asarray(pred)
    target = jnp.asarray(target)
    assert pred.shape == target.shape, "pred/target shape mismatch"
    total_n = pred.size
    if total_n == 0:
        return jnp.float32(jnp.nan)  # matches torch/np mean of an empty tensor

    # Keep 16-bit floats narrow into the kernel (halves HBM traffic); everything
    # else (ints, f64, mixed dtypes) is computed in f32.
    if (pred.dtype != target.dtype
            or pred.dtype not in (jnp.float32, jnp.bfloat16, jnp.float16)):
        pred = pred.astype(jnp.float32)
        target = target.astype(jnp.float32)

    p = jnp.ravel(pred)   # reshape of a contiguous array: zero-copy
    t = jnp.ravel(target)

    rem = total_n % _LANES
    tail_sum = jnp.float32(0.0)
    if rem:
        # Ragged (<128-element) tail: reduce it in plain JAX, it is negligible.
        dp = (p[total_n - rem:].astype(jnp.float32)
              - t[total_n - rem:].astype(jnp.float32))
        tail_sum = jnp.sum(jnp.abs(dp) if metric == "mae" else dp * dp)
        # NOTE: the prefix slice below may materialize a copy on this (rare)
        # ragged path; lane-aligned inputs skip it and reshape zero-copy.
        p = p[:total_n - rem]
        t = t[:total_n - rem]

    main_n = total_n - rem
    if main_n == 0:
        return (tail_sum / jnp.float32(total_n)).astype(jnp.float32)

    rows = main_n // _LANES
    main_sum = _error_sum_2d(p.reshape(rows, _LANES), t.reshape(rows, _LANES),
                             metric, rows)
    return ((main_sum + tail_sum) / jnp.float32(total_n)).astype(jnp.float32)


class Error:
    """Mirror of the PyTorch Error module (metric='mae' or 'mse')."""

    def __init__(self, metric="mae"):
        self.metric = metric

    def __call__(self, pred, target):
        return error_pallas(pred, target, self.metric)


if __name__ == "__main__":
    key = jax.random.PRNGKey(0)
    k1, k2, k3, k4, k5, k6 = jax.random.split(key, 6)

    mae_mod = Error(metric="mae")
    mse_mod = Error(metric="mse")

    # Shapes implied by the module: prediction/target tensors of a regression head.
    pred = jax.random.normal(k1, (2, 4, 16, 16), dtype=jnp.float32)
    target = jax.random.normal(k2, (2, 4, 16, 16), dtype=jnp.float32)
    mae = jax.block_until_ready(mae_mod(pred, target))
    mse = jax.block_until_ready(mse_mod(pred, target))
    ref_mae = jnp.mean(jnp.abs(pred - target))
    ref_mse = jnp.mean(jnp.square(pred - target))
    assert jnp.allclose(mae, ref_mae, rtol=1e-5, atol=1e-6), (mae, ref_mae)
    assert jnp.allclose(mse, ref_mse, rtol=1e-5, atol=1e-6), (mse, ref_mse)

    # Multi-tile path: several 4096x128 row tiles + a partial edge block
    # (exercises the masked last tile and, on multi-TC chips, the core split).
    pred_big = jax.random.normal(k3, (1024, 1040), dtype=jnp.float32)
    target_big = jax.random.normal(k4, (1024, 1040), dtype=jnp.float32)
    mae_big = jax.block_until_ready(mae_mod(pred_big, target_big))
    ref_mae_big = jnp.mean(jnp.abs(pred_big - target_big))
    assert jnp.allclose(mae_big, ref_mae_big, rtol=1e-4, atol=1e-6), (mae_big, ref_mae_big)

    # Ragged (non-lane-aligned) shape: kernel handles the 128-aligned prefix,
    # the <128-element tail is reduced in plain JAX.
    pred_r = jax.random.normal(k5, (3, 5, 17), dtype=jnp.float32)
    target_r = jax.random.normal(k6, (3, 5, 17), dtype=jnp.float32)
    mae_r = jax.block_until_ready(mae_mod(pred_r, target_r))
    ref_mae_r = jnp.mean(jnp.abs(pred_r - target_r))
    assert jnp.allclose(mae_r, ref_mae_r, rtol=1e-5, atol=1e-6), (mae_r, ref_mae_r)

    # bf16 inputs stay bf16 through HBM; accumulation is f32 in-kernel.
    pred_h = jax.random.normal(k3, (8, 2048), dtype=jnp.float32).astype(jnp.bfloat16)
    target_h = jax.random.normal(k4, (8, 2048), dtype=jnp.float32).astype(jnp.bfloat16)
    mse_h = jax.block_until_ready(mse_mod(pred_h, target_h))
    ref_mse_h = jnp.mean(jnp.square(pred_h.astype(jnp.float32)
                                    - target_h.astype(jnp.float32)))
    assert jnp.allclose(mse_h, ref_mse_h, rtol=1e-4, atol=1e-5), (mse_h, ref_mse_h)

    print("KERNEL_OK")
</pallas_src>

<mosaic_0001>
module attributes {stable_mosaic.version = 11 : i64} {
  func.func @_error_kernel(%arg0: i32, %arg1: i32, %arg2: memref<16x128xf32, #tpu.memory_space<vmem>>, %arg3: memref<16x128xf32, #tpu.memory_space<vmem>>, %arg4: memref<8x128xf32, #tpu.memory_space<vmem>>) attributes {dimension_semantics = [#tpu.dimension_semantics<arbitrary>, #tpu.dimension_semantics<arbitrary>], iteration_bounds = array<i64: 1, 1>, scalar_prefetch = 0 : i64, scratch_operands = 0 : i64, tpu.core_type = #tpu.core_type<tc>, window_params = [{transform_indices = @transform_0, window_bounds = array<i64: 16, 128>}, {transform_indices = @transform_1, window_bounds = array<i64: 16, 128>}, {transform_indices = @transform_2, window_bounds = array<i64: 8, 128>}]} {
    %c0_i32 = arith.constant 0 : i32
    %0 = arith.cmpi eq, %arg1, %c0_i32 : i32
    %1 = arith.extui %0 : i1 to i32
    %c0_i32_0 = arith.constant 0 : i32
    %2 = arith.cmpi ne, %1, %c0_i32_0 : i32
    scf.if %2 {
      %cst_8 = arith.constant 0.000000e+00 : f32
      %12 = vector.broadcast %cst_8 : f32 to vector<8x128xf32>
      %c0_9 = arith.constant 0 : index
      %c0_10 = arith.constant 0 : index
      %13 = vector.load %arg4[%c0_9, %c0_10] : memref<8x128xf32, #tpu.memory_space<vmem>>, vector<8x128xf32>
      tpu.vector_store %arg4[%c0_9, %c0_10], %12 {strides = array<i32>} : memref<8x128xf32, #tpu.memory_space<vmem>>, vector<8x128xf32>,
    } else {
    }
    %c0 = arith.constant 0 : index
    %c0_1 = arith.constant 0 : index
    %3 = vector.load %arg2[%c0, %c0_1] : memref<16x128xf32, #tpu.memory_space<vmem>>, vector<16x128xf32>
    %c0_2 = arith.constant 0 : index
    %c0_3 = arith.constant 0 : index
    %4 = vector.load %arg3[%c0_2, %c0_3] : memref<16x128xf32, #tpu.memory_space<vmem>>, vector<16x128xf32>
    %5 = arith.subf %3, %4 : vector<16x128xf32>
    %6 = math.absf %5 : vector<16x128xf32>
    %c0_4 = arith.constant 0 : index
    %c0_5 = arith.constant 0 : index
    %7 = vector.load %arg4[%c0_4, %c0_5] : memref<8x128xf32, #tpu.memory_space<vmem>>, vector<8x128xf32>
    %8 = vector.shape_cast %6 : vector<16x128xf32> to vector<2x8x128xf32>
    %cst = arith.constant dense<0.000000e+00> : vector<8x128xf32>
    %9 = vector.multi_reduction <add>, %8, %cst [0] : vector<2x8x128xf32> to vector<8x128xf32>
    %10 = arith.addf %7, %9 : vector<8x128xf32>
    %c0_6 = arith.constant 0 : index
    %c0_7 = arith.constant 0 : index
    %11 = vector.load %arg4[%c0_6, %c0_7] : memref<8x128xf32, #tpu.memory_space<vmem>>, vector<8x128xf32>
    tpu.vector_store %arg4[%c0_6, %c0_7], %10 {strides = array<i32>} : memref<8x128xf32, #tpu.memory_space<vmem>>, vector<8x128xf32>,
    return
  }
  func.func @transform_0(%arg0: i32, %arg1: i32) -> (i32, i32) {
    %c1_i32 = arith.constant 1 : i32
    %0 = arith.muli %arg0, %c1_i32 : i32
    %1 = arith.addi %0, %arg1 : i32
    %c0_i32 = arith.constant 0 : i32
    %c0_i32_0 = arith.constant 0 : i32
    return %1, %c0_i32 : i32, i32
  }
  func.func @transform_1(%arg0: i32, %arg1: i32) -> (i32, i32) {
    %c1_i32 = arith.constant 1 : i32
    %0 = arith.muli %arg0, %c1_i32 : i32
    %1 = arith.addi %0, %arg1 : i32
    %c0_i32 = arith.constant 0 : i32
    %c0_i32_0 = arith.constant 0 : i32
    return %1, %c0_i32 : i32, i32
  }
  func.func @transform_2(%arg0: i32, %arg1: i32) -> (i32, i32) {
    %c0_i32 = arith.constant 0 : i32
    %c0_i32_0 = arith.constant 0 : i32
    return %arg0, %c0_i32 : i32, i32
  }
}

</mosaic_0001>

<bundles_post_ra>
// kernel: tpu_custom_call.1
= control target key start
LH: loop header
LB: loop body
LE: loop exit
PB: predicated region body
PF: predicated region fallthrough
CT: control target
= control target key end

     0   :  { %7 = vsyncpa [#allocation3], 0  ;;  %s186_s0 = inlined_call_operand.hbm [shape: f32[16,128], index: 0, kind: input, shape index: {}]   ;;  %s187_s1 = inlined_call_operand.hbm [shape: f32[16,128], index: 1, kind: input, shape index: {}]   ;;  %s188_s2 = inlined_call_operand.hbm [shape: f32[8,128], index: 2, kind: output, shape index: {}]  }
   0x1   :  { %8 = vsyncpa [#allocation6], 0 }
   0x2   :  { %9 = vsyncpa [#allocation4], 0  ;;  %s157_s9 = smov [#allocation2]  }
   0x3   :  { %s19_s10 = sshll.u32 %s157_s9, 4  ;;  %s20_s10 = int_to_ptr.vmem [resolvable:$true] %s19_s10 }
   0x4   :  { %s99_s11 = scalar_lea.vmem %s20_s10, 256  ;;  %p104_p1 = scmp.lt.s32.totalorder %s20_s10, %s20_s10 }
   0x5   :  { %p100_p0 = scmp.ne.s32.totalorder %s20_s10, %s99_s11  ;;  %p105_p2 = scmp.lt.s32.totalorder %s99_s11, %s99_s11 }
   0x7   :  { %p106_p3 = por %p105_p2, %p104_p1 }
   0x9   :  { %p107_p4 = pnand %p106_p3, %p100_p0 }
   0xb   :  { %110 = shalt.err (!%p107_p4)
}
   0xc   :  { %s158_s12 = smov 128   ;;  %s159_s13 = smov 8  }
   0xd   :  { %25 = dma.hbm_to_vmem [thread:$0]  %s186_s0, 256, %s20_s10, [#allocation3], %s158_s12, %s158_s12, %s159_s13  }
   0xe   :  { %s160_s16 = smov [#allocation5]  }
   0xf   :  { %s35_s17 = sshll.u32 %s160_s16, 4  ;;  %s36_s17 = int_to_ptr.vmem [resolvable:$true] %s35_s17 }
  0x10   :  { %s119_s18 = scalar_lea.vmem %s36_s17, 256  ;;  %p124_p6 = scmp.lt.s32.totalorder %s36_s17, %s36_s17 }
  0x11   :  { %p120_p5 = scmp.ne.s32.totalorder %s36_s17, %s119_s18  ;;  %p125_p7 = scmp.lt.s32.totalorder %s119_s18, %s119_s18 }
  0x13   :  { %p126_p8 = por %p125_p7, %p124_p6 }
  0x15   :  { %p127_p9 = pnand %p126_p8, %p120_p5 }
  0x17   :  { %130 = shalt.err (!%p127_p9)
}
  0x18   :  { %41 = dma.hbm_to_vmem [thread:$0]  %s187_s1, 256, %s36_s17, [#allocation6], %s158_s12, %s158_s12, %s159_s13  }
  0x19   :  { %151 = dma.done.wait [#allocation3], 256  }
  0x1a   :  { %152 = vsyncadd [#allocation3], 4294967040 }
  0x1b   :  { %153 = dma.done.wait [#allocation6], 256  }
  0x1c   :  { %154 = vsyncadd [#allocation6], 4294967040  ;;  %v57_v0 = vld [vmem:[#allocation2] sm:$0xff]  ;;  %v58_v1 = vld [vmem:[#allocation2 + $0x8] sm:$0xff]  ;;  %s161_s0 = smov [#allocation7]  }
  0x1d   :  { %v59_v2 = vld [vmem:[#allocation5] sm:$0xff]  ;;  %v60_v3 = vld [vmem:[#allocation5 + $0x8] sm:$0xff]  ;;  %s75_s21 = sshll.u32 %s161_s0, 4  ;;  %s76_s21 = int_to_ptr.vmem [resolvable:$true] %s75_s21 }
  0x1e   :  { %v61_v4 = vsub.f32 %v57_v0, %v59_v2  ;;  %v62_v5 = vsub.f32 %v58_v1, %v60_v3  ;;  %s131_s22 = scalar_lea.vmem %s76_s21, 128  ;;  %p136_p11 = scmp.lt.s32.totalorder %s76_s21, %s76_s21 }
  0x1f   :  { %p132_p10 = scmp.ne.s32.totalorder %s76_s21, %s131_s22  ;;  %p137_p12 = scmp.lt.s32.totalorder %s131_s22, %s131_s22 }
  0x20   :  { %v63_v6 = vand.u32 2147483647, %v61_v4  ;;  %v64_v7 = vand.u32 2147483647, %v62_v5 }
  0x21   :  { %p138_p13 = por %p137_p12, %p136_p11 }
  0x22   :  { %v66_v8 = vadd.f32 %v64_v7, %v63_v6 }
  0x23   :  { %p139_p0 = pnand %p138_p13, %p132_p10 }
  0x24   :  { %68 = vst [vmem:[#allocation7] sm:$0xff] %v66_v8 }
  0x25   :  { %142 = shalt.err (!%p139_p0)
}
  0x26   :  { %78 = dma.vmem_to_hbm [thread:$0]  %s76_s21, 128, %s188_s2, [#allocation4]  }
  0x27   :  { %155 = dma.done.wait [#allocation4], 128  }
  0x28   :  { %156 = vsyncadd [#allocation4], 4294967168 }
  0x29   :  { %82 = vsyncpa [#allocation3], 1 }
  0x2a   :  { %83 = vsyncpa [#allocation6], 1 }
  0x2b   :  { %84 = vsyncpa [#allocation4], 1 }

</bundles_post_ra>
